<compile_context>
chip_gen: v5e
topology: v5e:2x2
jax: 0.10.0
libtpu: 0.0.40
codegen_flags: <defaults>
</compile_context>

<pallas_src>
import jax
import jax.numpy as jnp
from jax.experimental import pallas as pl
from jax.experimental.pallas import tpu as pltpu


def _discriminator_kernel(user_ref, group_ref, wfc_t_ref, bfc_ref,
                          wbil_t_ref, bbil_ref, out_ref):
    # user_ref  : [TB, N, I]  raw user inputs for this batch tile
    # group_ref : [TB, I]     raw group inputs for this batch tile
    # wfc_t_ref : [I, I]      fc weight, pre-transposed (x @ wfc_t == torch Linear)
    # bfc_ref   : [1, I]      fc bias
    # wbil_t_ref: [I, I]      bilinear weight W[0].T
    # bbil_ref  : [1, 1]      bilinear bias (SMEM scalar)
    # out_ref   : [TB, N]     scores, packed (sublane = batch rows, lane = N)
    TB, N, I = user_ref.shape

    wfc_t = wfc_t_ref[...]
    bfc = bfc_ref[...]

    # ---- group path (N-times smaller than the user path) --------------------
    # g = tanh(group @ Wfc^T + b);  t = g @ Wb^T  (cheap order: B*I*I flops)
    g = jnp.tanh(jnp.dot(group_ref[...], wfc_t,
                         preferred_element_type=jnp.float32) + bfc)        # [TB, I]
    t = jnp.dot(g, wbil_t_ref[...],
                preferred_element_type=jnp.float32)                        # [TB, I]

    # ---- user path: one MXU matmul over all TB*N rows of the tile -----------
    u = jnp.tanh(jnp.dot(user_ref[...].reshape(TB * N, I), wfc_t,
                         preferred_element_type=jnp.float32) + bfc)        # [TB*N, I]

    # ---- scores on VPU (multiply) + XLU (lane reduce); no M=1 MXU calls -----
    s = jnp.sum(u.reshape(TB, N, I) * t[:, None, :], axis=-1)              # [TB, N]
    out_ref[...] = s + bbil_ref[0, 0]                                      # SMEM bias


def _pick_block_b(B, N, I, itemsize):
    """Batch-tile rows: ~2 MiB of user rows per pipeline buffer, >= 2 grid
    steps when B > 8 (v7x megacore + pipelining), and block_b % 8 == 0 (or
    == B) so the 2-D group/output blocks satisfy the (8, 128) tiling rule."""
    if B <= 8:
        return B
    target = max(8, (2 << 20) // max(N * I * itemsize, 1))
    bb = min(B, target)
    bb = min(bb, max(8, -(-B // 2)))          # guarantee >= 2 grid steps
    return max(8, (bb // 8) * 8)


def _discriminator_call(group_inputs, user_inputs, wfc_t, bfc2, wbil_t, bbil2,
                        *, block_b=None):
    B, N, I = user_inputs.shape
    itemsize = jnp.dtype(user_inputs.dtype).itemsize

    if block_b is None:
        block_b = _pick_block_b(B, N, I, itemsize)
    block_b = max(1, min(int(block_b), B))
    if block_b != B and block_b % 8 != 0:          # keep blocks (8,128)-legal
        block_b = max(8, (block_b // 8) * 8) if B > 8 else B
    grid = (pl.cdiv(B, block_b),)

    # Explicit VMEM budget: double-buffered activations + resident weights +
    # headroom for in-kernel intermediates.
    vmem_need = (2 * block_b * N * I * itemsize        # user tile x2 buffers
                 + 2 * block_b * I * itemsize          # group tile x2 buffers
                 + 2 * block_b * N * 4                 # output tile x2 buffers
                 + 2 * (2 * I * I + I) * 4             # weights (even if x2)
                 + block_b * (N + 2) * I * 4)          # kernel intermediates
    vmem_limit = int(min(max(2 * vmem_need, 16 << 20), 64 << 20))

    cost = pl.CostEstimate(
        flops=2 * B * I * I * (N + 2) + 2 * B * N * I,
        transcendentals=B * (N + 1) * I,
        bytes_accessed=(B * N * I + B * I + 2 * I * I + I + B * N) * itemsize,
    )

    def build(single_buffer_weights):
        def wspec(shape):
            if single_buffer_weights:
                return pl.BlockSpec(shape, lambda i: (0,) * len(shape),
                                    pipeline_mode=pl.Buffered(1))
            return pl.BlockSpec(shape, lambda i: (0,) * len(shape))

        return pl.pallas_call(
            _discriminator_kernel,
            out_shape=jax.ShapeDtypeStruct((B, N), jnp.float32),
            grid=grid,
            in_specs=[
                pl.BlockSpec((block_b, N, I), lambda i: (i, 0, 0)),   # user tile
                pl.BlockSpec((block_b, I), lambda i: (i, 0)),         # group tile
                wspec((I, I)),                                        # wfc^T (resident)
                wspec((1, I)),                                        # bfc   (resident)
                wspec((I, I)),                                        # Wb^T  (resident)
                pl.BlockSpec((1, 1), lambda i: (0, 0),
                             memory_space=pltpu.MemorySpace.SMEM),    # bilinear bias
            ],
            out_specs=pl.BlockSpec((block_b, N), lambda i: (i, 0)),
            compiler_params=pltpu.CompilerParams(
                dimension_semantics=("parallel",),
                vmem_limit_bytes=vmem_limit),
            cost_estimate=cost,
        )

    args = (user_inputs, group_inputs, wfc_t, bfc2, wbil_t, bbil2)
    try:
        scores = build(True)(*args)
    except Exception:
        # TODO(synk): drop this fallback once single-buffered resident weights
        # (pl.Buffered(1)) are guaranteed by the deployed jax version.
        scores = build(False)(*args)

    # [B, N] -> [B, N, 1]: pure wrapper-side layout (same flat order).
    return scores[..., None]


def make_discriminator_forward(wfc, bfc, wbil, bbil, *, block_b=None):
    """Pre-transpose / reshape parameters ONCE (outside the per-step hot path)
    and return forward(group_inputs, user_inputs, group_mask) -> [B, N, 1]."""
    I = wfc.shape[0]
    wfc_t = jnp.asarray(wfc, jnp.float32).T            # x @ wfc_t == torch Linear
    bfc2 = jnp.asarray(bfc, jnp.float32).reshape(1, I)
    wbil_t = jnp.asarray(wbil, jnp.float32)[0].T       # [I, I]
    bbil2 = jnp.asarray(bbil, jnp.float32).reshape(1, 1)

    def forward(group_inputs, user_inputs, group_mask):
        del group_mask                                  # forward() never uses it
        return _discriminator_call(group_inputs, user_inputs,
                                   wfc_t, bfc2, wbil_t, bbil2, block_b=block_b)

    return forward


def discriminator_forward(group_inputs, user_inputs, group_mask,
                          wfc, bfc, wbil, bbil, *, block_b=None):
    """One-shot convenience wrapper (re-derives the transposed weights)."""
    fwd = make_discriminator_forward(wfc, bfc, wbil, bbil, block_b=block_b)
    return fwd(group_inputs, user_inputs, group_mask)


def _reference_forward(group_inputs, user_inputs, wfc, bfc, wbil, bbil):
    g = jnp.tanh(group_inputs @ wfc.T + bfc)                 # [B, I]
    u = jnp.tanh(user_inputs @ wfc.T + bfc)                  # [B, N, I]
    # torch Bilinear: out[b,n,0] = sum_ij u[b,n,i] W[0,i,j] g[b,j] + bias
    s = jnp.einsum("bni,ij,bj->bn", u, wbil[0], g) + bbil[0]
    return s[..., None]                                      # [B, N, 1]


if __name__ == "__main__":
    B, N, G, I = 16, 8, 8, 64          # embedding_dim = 64 (module default)

    key = jax.random.PRNGKey(0)
    k1, k2, k3, k4, k5, k6 = jax.random.split(key, 6)

    group_inputs = jax.random.normal(k1, (B, I), jnp.float32)
    user_inputs = jax.random.normal(k2, (B, N, I), jnp.float32)
    group_mask = jnp.zeros((B, G), jnp.float32)        # unused by forward

    # torch zeros the bilinear weight/bias; use small random values instead so
    # the bilinear path is actually exercised (forward is parameter-agnostic).
    xavier = (6.0 / (I + I)) ** 0.5
    wfc = jax.random.uniform(k3, (I, I), jnp.float32, -xavier, xavier)
    bfc = jax.random.normal(k4, (I,), jnp.float32) * 0.1
    wbil = jax.random.normal(k5, (1, I, I), jnp.float32) * 0.05
    bbil = jax.random.normal(k6, (1,), jnp.float32) * 0.1

    # Cached-weight forward; default block_b heuristic gives block_b=8 ->
    # grid=(2,), so the parallel batch axis / pipelining is actually exercised.
    forward = make_discriminator_forward(wfc, bfc, wbil, bbil)
    out = jax.block_until_ready(forward(group_inputs, user_inputs, group_mask))

    ref = _reference_forward(group_inputs, user_inputs, wfc, bfc, wbil, bbil)
    assert out.shape == (B, N, 1), out.shape
    err = jnp.max(jnp.abs(out - ref))
    assert jnp.allclose(out, ref, atol=1e-3, rtol=1e-3), f"max err {err}"

    print("KERNEL_OK")
</pallas_src>

<mosaic_0001>
module attributes {stable_mosaic.version = 11 : i64} {
  func.func @_discriminator_kernel(%arg0: i32, %arg1: memref<8x8x64xf32, #tpu.memory_space<vmem>>, %arg2: memref<8x64xf32, #tpu.memory_space<vmem>>, %arg3: memref<64x64xf32, #tpu.memory_space<vmem>>, %arg4: memref<1x64xf32, #tpu.memory_space<vmem>>, %arg5: memref<64x64xf32, #tpu.memory_space<vmem>>, %arg6: memref<1x1xf32, #tpu.memory_space<smem>>, %arg7: memref<8x8xf32, #tpu.memory_space<vmem>>) attributes {dimension_semantics = [#tpu.dimension_semantics<parallel>], iteration_bounds = array<i64: 2>, scalar_prefetch = 0 : i64, scratch_operands = 0 : i64, tpu.core_type = #tpu.core_type<tc>, window_params = [{transform_indices = @transform_0, window_bounds = array<i64: 8, 8, 64>}, {transform_indices = @transform_1, window_bounds = array<i64: 8, 64>}, {pipeline_mode = #tpu.pipeline_mode<synchronous>, transform_indices = @transform_2, window_bounds = array<i64: 64, 64>}, {pipeline_mode = #tpu.pipeline_mode<synchronous>, transform_indices = @transform_3, window_bounds = array<i64: 1, 64>}, {pipeline_mode = #tpu.pipeline_mode<synchronous>, transform_indices = @transform_4, window_bounds = array<i64: 64, 64>}, {transform_indices = @transform_5, window_bounds = array<i64: 1, 1>}, {transform_indices = @transform_6, window_bounds = array<i64: 8, 8>}]} {
    %c0 = arith.constant 0 : index
    %c0_0 = arith.constant 0 : index
    %0 = vector.load %arg3[%c0, %c0_0] : memref<64x64xf32, #tpu.memory_space<vmem>>, vector<64x64xf32>
    %c0_1 = arith.constant 0 : index
    %c0_2 = arith.constant 0 : index
    %1 = vector.load %arg4[%c0_1, %c0_2] : memref<1x64xf32, #tpu.memory_space<vmem>>, vector<1x64xf32>
    %c0_3 = arith.constant 0 : index
    %c0_4 = arith.constant 0 : index
    %2 = vector.load %arg2[%c0_3, %c0_4] : memref<8x64xf32, #tpu.memory_space<vmem>>, vector<8x64xf32>
    %cst = arith.constant dense<0.000000e+00> : vector<8x64xf32>
    %3 = tpu.matmul %2, %0, %cst {dimension_numbers = #tpu.dot_dimension_numbers<[1], [0], [0], [1], [0, 0, 1, 1], [], []>} : vector<8x64xf32>, vector<64x64xf32>, vector<8x64xf32> -> vector<8x64xf32>
    %4 = vector.broadcast %1 : vector<1x64xf32> to vector<8x64xf32>
    %5 = arith.addf %3, %4 : vector<8x64xf32>
    %6 = math.tanh %5 : vector<8x64xf32>
    %c0_5 = arith.constant 0 : index
    %c0_6 = arith.constant 0 : index
    %7 = vector.load %arg5[%c0_5, %c0_6] : memref<64x64xf32, #tpu.memory_space<vmem>>, vector<64x64xf32>
    %cst_7 = arith.constant dense<0.000000e+00> : vector<8x64xf32>
    %8 = tpu.matmul %6, %7, %cst_7 {dimension_numbers = #tpu.dot_dimension_numbers<[1], [0], [0], [1], [0, 0, 1, 1], [], []>} : vector<8x64xf32>, vector<64x64xf32>, vector<8x64xf32> -> vector<8x64xf32>
    %c0_8 = arith.constant 0 : index
    %c0_9 = arith.constant 0 : index
    %c0_10 = arith.constant 0 : index
    %9 = vector.load %arg1[%c0_8, %c0_9, %c0_10] : memref<8x8x64xf32, #tpu.memory_space<vmem>>, vector<8x8x64xf32>
    %10 = vector.shape_cast %9 : vector<8x8x64xf32> to vector<64x64xf32>
    %cst_11 = arith.constant dense<0.000000e+00> : vector<64x64xf32>
    %11 = tpu.matmul %10, %0, %cst_11 {dimension_numbers = #tpu.dot_dimension_numbers<[1], [0], [0], [1], [0, 0, 1, 1], [], []>} : vector<64x64xf32>, vector<64x64xf32>, vector<64x64xf32> -> vector<64x64xf32>
    %12 = vector.broadcast %1 : vector<1x64xf32> to vector<64x64xf32>
    %13 = arith.addf %11, %12 : vector<64x64xf32>
    %14 = math.tanh %13 : vector<64x64xf32>
    %15 = vector.shape_cast %14 : vector<64x64xf32> to vector<8x8x64xf32>
    %16 = vector.shape_cast %8 : vector<8x64xf32> to vector<8x1x64xf32>
    %17 = vector.broadcast %16 : vector<8x1x64xf32> to vector<8x8x64xf32>
    %18 = arith.mulf %15, %17 : vector<8x8x64xf32>
    %cst_12 = arith.constant dense<0.000000e+00> : vector<8x8xf32>
    %19 = vector.multi_reduction <add>, %18, %cst_12 [2] : vector<8x8x64xf32> to vector<8x8xf32>
    %c0_13 = arith.constant 0 : index
    %c0_14 = arith.constant 0 : index
    %20 = memref.load %arg6[%c0_13, %c0_14] : memref<1x1xf32, #tpu.memory_space<smem>>
    %21 = vector.broadcast %20 : f32 to vector<8x8xf32>
    %22 = arith.addf %19, %21 : vector<8x8xf32>
    %c0_15 = arith.constant 0 : index
    %c0_16 = arith.constant 0 : index
    %23 = vector.load %arg7[%c0_15, %c0_16] : memref<8x8xf32, #tpu.memory_space<vmem>>, vector<8x8xf32>
    tpu.vector_store %arg7[%c0_15, %c0_16], %22 {strides = array<i32>} : memref<8x8xf32, #tpu.memory_space<vmem>>, vector<8x8xf32>,
    return
  }
  func.func @transform_0(%arg0: i32) -> (i32, i32, i32) {
    %c0_i32 = arith.constant 0 : i32
    %c0_i32_0 = arith.constant 0 : i32
    %c0_i32_1 = arith.constant 0 : i32
    return %arg0, %c0_i32, %c0_i32_0 : i32, i32, i32
  }
  func.func @transform_1(%arg0: i32) -> (i32, i32) {
    %c0_i32 = arith.constant 0 : i32
    %c0_i32_0 = arith.constant 0 : i32
    return %arg0, %c0_i32 : i32, i32
  }
  func.func @transform_2(%arg0: i32) -> (i32, i32) {
    %c0_i32 = arith.constant 0 : i32
    %c0_i32_0 = arith.constant 0 : i32
    %c0_i32_1 = arith.constant 0 : i32
    return %c0_i32, %c0_i32_0 : i32, i32
  }
  func.func @transform_3(%arg0: i32) -> (i32, i32) {
    %c0_i32 = arith.constant 0 : i32
    %c0_i32_0 = arith.constant 0 : i32
    %c0_i32_1 = arith.constant 0 : i32
    return %c0_i32, %c0_i32_0 : i32, i32
  }
  func.func @transform_4(%arg0: i32) -> (i32, i32) {
    %c0_i32 = arith.constant 0 : i32
    %c0_i32_0 = arith.constant 0 : i32
    %c0_i32_1 = arith.constant 0 : i32
    return %c0_i32, %c0_i32_0 : i32, i32
  }
  func.func @transform_5(%arg0: i32) -> (i32, i32) {
    %c0_i32 = arith.constant 0 : i32
    %c0_i32_0 = arith.constant 0 : i32
    %c0_i32_1 = arith.constant 0 : i32
    return %c0_i32, %c0_i32_0 : i32, i32
  }
  func.func @transform_6(%arg0: i32) -> (i32, i32) {
    %c0_i32 = arith.constant 0 : i32
    %c0_i32_0 = arith.constant 0 : i32
    return %arg0, %c0_i32 : i32, i32
  }
}

module attributes {stable_mosaic.version = 11 : i64} {
  func.func @_discriminator_kernel(%arg0: i32, %arg1: memref<8x8x64xf32, #tpu.memory_space<vmem>>, %arg2: memref<8x64xf32, #tpu.memory_space<vmem>>, %arg3: memref<64x64xf32, #tpu.memory_space<vmem>>, %arg4: memref<1x64xf32, #tpu.memory_space<vmem>>, %arg5: memref<64x64xf32, #tpu.memory_space<vmem>>, %arg6: memref<1x1xf32, #tpu.memory_space<smem>>, %arg7: memref<8x8xf32, #tpu.memory_space<vmem>>) attributes {dimension_semantics = [#tpu.dimension_semantics<parallel>], iteration_bounds = array<i64: 2>, scalar_prefetch = 0 : i64, scratch_operands = 0 : i64, tpu.core_type = #tpu.core_type<tc>, window_params = [{transform_indices = @transform_0, window_bounds = array<i64: 8, 8, 64>}, {transform_indices = @transform_1, window_bounds = array<i64: 8, 64>}, {pipeline_mode = #tpu.pipeline_mode<synchronous>, transform_indices = @transform_2, window_bounds = array<i64: 64, 64>}, {pipeline_mode = #tpu.pipeline_mode<synchronous>, transform_indices = @transform_3, window_bounds = array<i64: 1, 64>}, {pipeline_mode = #tpu.pipeline_mode<synchronous>, transform_indices = @transform_4, window_bounds = array<i64: 64, 64>}, {transform_indices = @transform_5, window_bounds = array<i64: 1, 1>}, {transform_indices = @transform_6, window_bounds = array<i64: 8, 8>}]} {
    %c0 = arith.constant 0 : index
    %c0_0 = arith.constant 0 : index
    %0 = vector.load %arg3[%c0, %c0_0] : memref<64x64xf32, #tpu.memory_space<vmem>>, vector<64x64xf32>
    %c0_1 = arith.constant 0 : index
    %c0_2 = arith.constant 0 : index
    %1 = vector.load %arg4[%c0_1, %c0_2] : memref<1x64xf32, #tpu.memory_space<vmem>>, vector<1x64xf32>
    %c0_3 = arith.constant 0 : index
    %c0_4 = arith.constant 0 : index
    %2 = vector.load %arg2[%c0_3, %c0_4] : memref<8x64xf32, #tpu.memory_space<vmem>>, vector<8x64xf32>
    %cst = arith.constant dense<0.000000e+00> : vector<8x64xf32>
    %3 = tpu.matmul %2, %0, %cst {dimension_numbers = #tpu.dot_dimension_numbers<[1], [0], [0], [1], [0, 0, 1, 1], [], []>} : vector<8x64xf32>, vector<64x64xf32>, vector<8x64xf32> -> vector<8x64xf32>
    %4 = vector.broadcast %1 : vector<1x64xf32> to vector<8x64xf32>
    %5 = arith.addf %3, %4 : vector<8x64xf32>
    %6 = math.tanh %5 : vector<8x64xf32>
    %c0_5 = arith.constant 0 : index
    %c0_6 = arith.constant 0 : index
    %7 = vector.load %arg5[%c0_5, %c0_6] : memref<64x64xf32, #tpu.memory_space<vmem>>, vector<64x64xf32>
    %cst_7 = arith.constant dense<0.000000e+00> : vector<8x64xf32>
    %8 = tpu.matmul %6, %7, %cst_7 {dimension_numbers = #tpu.dot_dimension_numbers<[1], [0], [0], [1], [0, 0, 1, 1], [], []>} : vector<8x64xf32>, vector<64x64xf32>, vector<8x64xf32> -> vector<8x64xf32>
    %c0_8 = arith.constant 0 : index
    %c0_9 = arith.constant 0 : index
    %c0_10 = arith.constant 0 : index
    %9 = vector.load %arg1[%c0_8, %c0_9, %c0_10] : memref<8x8x64xf32, #tpu.memory_space<vmem>>, vector<8x8x64xf32>
    %10 = vector.shape_cast %9 : vector<8x8x64xf32> to vector<64x64xf32>
    %cst_11 = arith.constant dense<0.000000e+00> : vector<64x64xf32>
    %11 = tpu.matmul %10, %0, %cst_11 {dimension_numbers = #tpu.dot_dimension_numbers<[1], [0], [0], [1], [0, 0, 1, 1], [], []>} : vector<64x64xf32>, vector<64x64xf32>, vector<64x64xf32> -> vector<64x64xf32>
    %12 = vector.broadcast %1 : vector<1x64xf32> to vector<64x64xf32>
    %13 = arith.addf %11, %12 : vector<64x64xf32>
    %14 = math.tanh %13 : vector<64x64xf32>
    %15 = vector.shape_cast %14 : vector<64x64xf32> to vector<8x8x64xf32>
    %16 = vector.shape_cast %8 : vector<8x64xf32> to vector<8x1x64xf32>
    %17 = vector.broadcast %16 : vector<8x1x64xf32> to vector<8x8x64xf32>
    %18 = arith.mulf %15, %17 : vector<8x8x64xf32>
    %cst_12 = arith.constant dense<0.000000e+00> : vector<8x8xf32>
    %19 = vector.multi_reduction <add>, %18, %cst_12 [2] : vector<8x8x64xf32> to vector<8x8xf32>
    %c0_13 = arith.constant 0 : index
    %c0_14 = arith.constant 0 : index
    %20 = memref.load %arg6[%c0_13, %c0_14] : memref<1x1xf32, #tpu.memory_space<smem>>
    %21 = vector.broadcast %20 : f32 to vector<8x8xf32>
    %22 = arith.addf %19, %21 : vector<8x8xf32>
    %c0_15 = arith.constant 0 : index
    %c0_16 = arith.constant 0 : index
    %23 = vector.load %arg7[%c0_15, %c0_16] : memref<8x8xf32, #tpu.memory_space<vmem>>, vector<8x8xf32>
    tpu.vector_store %arg7[%c0_15, %c0_16], %22 {strides = array<i32>} : memref<8x8xf32, #tpu.memory_space<vmem>>, vector<8x8xf32>,
    return
  }
  func.func @transform_0(%arg0: i32) -> (i32, i32, i32) {
    %c0_i32 = arith.constant 0 : i32
    %c0_i32_0 = arith.constant 0 : i32
    %c0_i32_1 = arith.constant 0 : i32
    return %arg0, %c0_i32, %c0_i32_0 : i32, i32, i32
  }
  func.func @transform_1(%arg0: i32) -> (i32, i32) {
    %c0_i32 = arith.constant 0 : i32
    %c0_i32_0 = arith.constant 0 : i32
    return %arg0, %c0_i32 : i32, i32
  }
  func.func @transform_2(%arg0: i32) -> (i32, i32) {
    %c0_i32 = arith.constant 0 : i32
    %c0_i32_0 = arith.constant 0 : i32
    %c0_i32_1 = arith.constant 0 : i32
    return %c0_i32, %c0_i32_0 : i32, i32
  }
  func.func @transform_3(%arg0: i32) -> (i32, i32) {
    %c0_i32 = arith.constant 0 : i32
    %c0_i32_0 = arith.constant 0 : i32
    %c0_i32_1 = arith.constant 0 : i32
    return %c0_i32, %c0_i32_0 : i32, i32
  }
  func.func @transform_4(%arg0: i32) -> (i32, i32) {
    %c0_i32 = arith.constant 0 : i32
    %c0_i32_0 = arith.constant 0 : i32
    %c0_i32_1 = arith.constant 0 : i32
    return %c0_i32, %c0_i32_0 : i32, i32
  }
  func.func @transform_5(%arg0: i32) -> (i32, i32) {
    %c0_i32 = arith.constant 0 : i32
    %c0_i32_0 = arith.constant 0 : i32
    %c0_i32_1 = arith.constant 0 : i32
    return %c0_i32, %c0_i32_0 : i32, i32
  }
  func.func @transform_6(%arg0: i32) -> (i32, i32) {
    %c0_i32 = arith.constant 0 : i32
    %c0_i32_0 = arith.constant 0 : i32
    return %arg0, %c0_i32 : i32, i32
  }
}

</mosaic_0001>

<bundles_post_ra>
// kernel: tpu_custom_call.1
= control target key start
LH: loop header
LB: loop body
LE: loop exit
PB: predicated region body
PF: predicated region fallthrough
CT: control target
= control target key end

     0   :  { %s1227_s0 = inlined_call_operand.hbm [shape: f32[16,8,64], index: 0, kind: input, shape index: {}]   ;;  %s1228_s1 = inlined_call_operand.hbm [shape: f32[16,64], index: 1, kind: input, shape index: {}]   ;;  %s1229_s2 = inlined_call_operand.hbm [shape: f32[64,64], index: 2, kind: input, shape index: {}]   ;;  %s1230_s3 = inlined_call_operand.vmem [shape: f32[1,64], index: 3, kind: input, shape index: {}]   ;;  %s1231_s4 = inlined_call_operand.hbm [shape: f32[64,64], index: 4, kind: input, shape index: {}]   ;;  %s1232_s5 = inlined_call_operand.<no memory space> [shape: f32[1,1], index: 5, kind: input, shape index: {}]   ;;  %s1233_s6 = inlined_call_operand.vmem [shape: f32[16,8], index: 6, kind: output, shape index: {}]  }
   0x1   :  { %1234 = sst [smem:[#allocation14_spill]] %s1229_s2 }
   0x2   :  { %11 = sst [smem:[#allocation2]] %s1232_s5 }
   0x3   :  { %12 = vsyncpa [#allocation4], 0 }
   0x4   :  { %14 = vsyncpa [#allocation4 + $0x1], 0 }
   0x5   :  { %15 = vsyncpa [#allocation6], 0 }
   0x6   :  { %17 = vsyncpa [#allocation6 + $0x1], 0 }
   0x7   :  { %18 = vsyncpa [#allocation9], 0  ;;  %s1045_s23 = smov 0   ;;  %s1047_s24 = smov 0  }
   0x8   :  { %s1049_s25 = smov 0   ;;  %s1051_s26 = smov 0  }
   0x9 LB: > { %s1064_s5 = sadd.s32 4294967295, %s1001_s26   ;;  %p44_p0 = scmp.ne.s32.totalorder %s993_s24, %s989_s23  ;;  %s1001_s26 = sphi %s1051_s26, %s1242_s26   ;;  %s997_s25 = sphi %s1049_s25, %s1241_s25   ;;  %s993_s24 = sphi %s1047_s24, %s1240_s24   ;;  %s989_s23 = sphi %s1045_s23, %s1239_s23  }
   0xa   : > { %p45_p1 = scmp.eq.s32.totalorder %s1064_s5, 0  ;;  %p705_p2 = scmp.ge.s32.totalorder %s1001_s26, 1 }
   0xb   : > { %p191_p3 = scmp.lt.s32.totalorder %s1001_s26, 3  ;;  %s1236_s2 = sld [smem:[#allocation14_spill]] }
   0xc   : > { %p1072_p4 = por %p45_p1, %p44_p0  ;;  %s1003_s8 = smov [#allocation7]  }
   0xd   : > { %p1079_p5 = pnand %p705_p2, %p191_p3  ;;  %s204_s9 = sshll.u32 %s1003_s8, 4  ;;  %s205_s9 = int_to_ptr.vmem [resolvable:$true] %s204_s9 }
   0xe   : > { %s219_s12 = sshll.u32 %s1231_s4, 4  ;;  %s1004_s13 = smov 128   ;;  %s220_s12 = int_to_ptr.hbm [resolvable:$true] %s219_s12 }
   0xf   : > { %p761_p6 = pneg %p1079_p5  ;;  %s1005_s14 = smov 8  }
  0x10   : > { %s1006_s15 = smov [#allocation8]   ;;  %s1097_s17 = sadd.s32 1, %s1001_s26  }
  0x11   : > { %s202_s30 = sshll.u32 %s1236_s2, 4  ;;  %p762_p7 = pnand %p761_p6, %p45_p1  ;;  %s203_s30 = int_to_ptr.hbm [resolvable:$true] %s202_s30 }
  0x12   : > { %s221_s16 = sshll.u32 %s1006_s15, 4  ;;  %s31_s18 = sadd.s32 1, %s997_s25  ;;  %s222_s16 = int_to_ptr.vmem [resolvable:$true] %s221_s16 }
  0x13   : > { %764 = dma.hbm_to_vmem [thread:$0]  (!%p762_p7), %s203_s30, 1024, %s205_s9, [#allocation6], %s1004_s13, %s1004_s13, %s1005_s14  }
  0x14   : > { %767 = dma.hbm_to_vmem [thread:$0]  (!%p762_p7), %s220_s12, 1024, %s222_s16, [#allocation9], %s1004_s13, %s1004_s13, %s1005_s14  }
  0x15   : > { %s28_s19 = ssub.s32 %s1001_s26, %s1097_s17  ;;  %p38_p8 = scmp.ne.s32.totalorder %s997_s25, %s993_s24 }
  0x16   : > { %p29_p9 = scmp.eq.s32.totalorder %s28_s19, 0  ;;  %p39_p10 = scmp.eq.s32.totalorder %s1001_s26, 0 }
  0x17   : > { %p777_p11 = scmp.lt.s32.totalorder %s1001_s26, 2  ;;  %s1107_s20 = sand.u32 1, %s997_s25  }
  0x18   : > { %s1110_s21 = scalar_select %p29_p9, %s997_s25, %s31_s18  }
  0x19   : > { %p40_p12 = por %p39_p10, %p38_p8  ;;  %s709_s22 = sshll.u32 %s1107_s20, 6 }
  0x1a   : > { %s732_s23 = sshll.u32 %s1001_s26, 6  ;;  %s242_s9 = scalar_lea.vmem [#allocation3], %s709_s22 }
  0x1b   : > { %s247_s30 = scalar_lea.hbm %s1227_s0, %s732_s23  ;;  %s250_s10 = sshll.u32 %s242_s9, 4  ;;  %s251_s10 = int_to_ptr.vmem [resolvable:$true] %s250_s10 }
  0x1c   : > { %s248_s8 = sshll.u32 %s247_s30, 4  ;;  %p1117_p13 = pnand %p777_p11, %p40_p12  ;;  %s249_s8 = int_to_ptr.hbm [resolvable:$true] %s248_s8 }
  0x1d   : > { %s260_s12 = sand.u32 1, %s1001_s26   ;;  %s712_s15 = sshll.u32 %s1107_s20, 3 }
  0x1e   : > { %s239_s16 = scalar_lea.sflag [#allocation4], %s1107_s20  ;;  %s895_s18 = sshra.s32 %s249_s8, 4  ;;  %s896_s18 = int_to_ptr.hbm [resolvable:$true] %s895_s18 }
  0x1f   : > { %s897_s19 = scalar_lea.hbm %s896_s18, 64  ;;  %p899_p2 = pneg %p1117_p13 }
  0x20   : > { %p898_p0 = scmp.ne.s32.totalorder %s896_s18, %s897_s19  ;;  %s902_s28 = scalar_lea.hbm %s1227_s0, 128 }
  0x21   : > { %p903_p7 = scmp.lt.s32.totalorder %s896_s18, %s1227_s0  ;;  %p904_p8 = scmp.lt.s32.totalorder %s902_s28, %s897_s19 }
  0x22   : > { %p900_p3 = pnand %p899_p2, %p898_p0 }
  0x23   : > { %p905_p9 = por %p904_p8, %p903_p7 }
  0x24   : > { %p901_p6 = pneg %p900_p3 }
  0x26   : > { %p906_p10 = pnand %p905_p9, %p901_p6 }
  0x28   : > { %909 = shalt.err (!%p906_p10)
}
  0x29   : > { %771 = dma.hbm_to_vmem [thread:$0]  (!%p1117_p13), %s249_s8, 1024, %s251_s10, %s239_s16, %s1004_s13, %s1004_s13, %s1005_s14  }
  0x2a   : > { %s713_s20 = sshll.u32 %s1001_s26, 3  ;;  %s264_s9 = scalar_lea.vmem [#allocation5], %s712_s15 }
  0x2b   : > { %s272_s22 = sshll.u32 %s264_s9, 4  ;;  %s268_s29 = scalar_lea.hbm %s1228_s1, %s713_s20  ;;  %s273_s22 = int_to_ptr.vmem [resolvable:$true] %s272_s22 }
  0x2c   : > { %s270_s18 = sshll.u32 %s268_s29, 4  ;;  %s261_s19 = scalar_lea.sflag [#allocation6], %s260_s12  ;;  %s271_s18 = int_to_ptr.hbm [resolvable:$true] %s270_s18 }
  0x2d   : > { %s925_s28 = sshra.s32 %s271_s18, 4  ;;  %s932_s14 = scalar_lea.hbm %s1228_s1, 16  ;;  %s926_s28 = int_to_ptr.hbm [resolvable:$true] %s925_s28 }
  0x2e   : > { %s927_s30 = scalar_lea.hbm %s926_s28, 8  ;;  %p933_p3 = scmp.lt.s32.totalorder %s926_s28, %s1228_s1 }
  0x2f   : > { %p928_p11 = scmp.ne.s32.totalorder %s926_s28, %s927_s30  ;;  %p934_p6 = scmp.lt.s32.totalorder %s932_s14, %s927_s30 }
  0x31   : > { %p930_p12 = pnand %p928_p11, %p899_p2  ;;  %p935_p7 = por %p934_p6, %p933_p3 }
  0x33   : > { %p931_p0 = pneg %p930_p12 }
  0x35   : > { %p936_p8 = pnand %p935_p7, %p931_p0 }
  0x37   : > { %939 = shalt.err (!%p936_p8)
}
  0x38   : > { %774 = dma.hbm_to_vmem [thread:$0]  (!%p1117_p13), %s271_s18, 128, %s273_s22, %s261_s19  }
  0x39   : > { %281 = sbr.rel (%p1079_p5) target bundleno = 492 (0x1ec), region = 44  ;;  %s283_s2 = sand.u32 (!%p1079_p5), 1, %s993_s24  }
  0x3a   : > { %s715_s12 = sshll.u32 (!%p1079_p5), %s283_s2, 6  ;;  %s284_s15 = scalar_lea.sflag (!%p1079_p5), [#allocation4], %s283_s2 }
  0x3b   : > { %s1158_s16 = scalar_lea.vmem (!%p1079_p5), [#allocation3], %s715_s12 }
  0x3e   : > { %972 = dma.done.wait (%p1072_p4), %s284_s15, 1024  }
  0x3f   : > { %974 = vsyncadd (%p1072_p4), %s284_s15, 4294966272  ;;  %s293_s20 = sand.u32 1, %s1064_s5   ;;  %s716_s11 = sshll.u32 %s283_s2, 3 }
  0x40   : > { %s294_s9 = scalar_lea.sflag [#allocation6], %s293_s20  ;;  %s1165_s22 = scalar_lea.vmem [#allocation5], %s716_s11 }
  0x41   : > { %976 = dma.done.wait (%p1072_p4), %s294_s9, 128  }
  0x42   : > { %978 = vsyncadd (%p1072_p4), %s294_s9, 4294967168 }
  0x43   : > { %980 = dma.done.wait (%p45_p1), [#allocation6], 1024  }
  0x44   : > { %982 = vsyncadd (%p45_p1), [#allocation6], 4294966272 }
  0x45   : > { %984 = dma.done.wait (%p45_p1), [#allocation9], 1024  }
  0x46   : > { %986 = vsyncadd (%p45_p1), [#allocation9], 4294966272  ;;  %v353_v0 = vld [vmem:[#allocation7 + $0x38] sm:$0xff]  ;;  %v352_v1 = vld [vmem:[#allocation7 + $0x30] sm:$0xff]  ;;  %vm359_vm0 = vcmask 523264   ;;  %s552_s23 = sld [smem:[#allocation2]] }
  0x47   : > { %371 = vmatpush.msra.mxu1 %v353_v0  ;;  %733 = vmatpush.msra.mxu2 %v353_v0  ;;  %v351_v2 = vld [vmem:[#allocation7 + $0x28] sm:$0xff]  ;;  %v350_v3 = vld [vmem:[#allocation7 + $0x20] sm:$0xff]  ;;  %v349_v4 = vld [vmem:[#allocation7 + $0x18] sm:$0xff]  ;;  %vm580_vm1 = vcmask 1041409   ;;  %vm582_vm2 = vcmask 1042434   ;;  %p342_p1 = scmp.lt.s32.totalorder %s1064_s5, 1 }
  0x48   : > { %734 = vmatpush.msra.mxu3 %v353_v0  ;;  %455 = vmatpush.msra.mxu0 %v353_v0  ;;  %v348_v5 = vld [vmem:[#allocation7 + $0x10] sm:$0xff]  ;;  %v347_v6 = vld [vmem:[#allocation7 + $0x8] sm:$0xff]  ;;  %v346_v7 = vld [vmem:[#allocation7] sm:$0xff]  ;;  %vm584_vm3 = vcmask 1043459   ;;  %vm586_vm4 = vcmask 1044484   ;;  %vm588_vm5 = vcmask 1045509  }
  0x49   : > { %372 = vmatpush.msra.mxu1 %v352_v1  ;;  %735 = vmatpush.msra.mxu2 %v352_v1  ;;  %v355_v8 = vld [vmem:[%s1165_s22] sm:$0xff]  ;;  %v417_v9 = vld [vmem:[%s1158_s16 + $0x10] sm:$0xff]  ;;  %v389_v14 = vld [vmem:[#allocation8 + $0x28] sm:$0xff]  ;;  %s1244_s5 = smov (!%p342_p1, %s1064_s5), 1  ;;  %vm590_vm6 = vcmask 1046534   ;;  %vm592_vm7 = vcmask 1047559  }
  0x4a   : > { %736 = vmatpush.msra.mxu3 %v352_v1  ;;  %456 = vmatpush.msra.mxu0 %v352_v1  ;;  %v420_v10 = vld [vmem:[%s1158_s16 + $0x28] sm:$0xff]  ;;  %v415_v12 = vld [vmem:[%s1158_s16] sm:$0xff]  ;;  %v418_v15 = vld [vmem:[%s1158_s16 + $0x18] sm:$0xff]  ;;  %s719_s29 = sshll.u32 %s1244_s5, 3  ;;  %vm595_vm8 = vcmask 64512  }
  0x4b   : > { %373 = vmatpush.msra.mxu1 %v351_v2  ;;  %737 = vmatpush.msra.mxu2 %v351_v2  ;;  %v391_v11 = vld [vmem:[#allocation8 + $0x38] sm:$0xff]  ;;  %v390_v13 = vld [vmem:[#allocation8 + $0x30] sm:$0xff]  ;;  %v421_v16 = vld [vmem:[%s1158_s16 + $0x30] sm:$0xff]  ;;  %s345_s28 = scalar_lea.vmem %s1233_s6, %s719_s29 }
  0x4c   : > { %738 = vmatpush.msra.mxu3 %v351_v2  ;;  %457 = vmatpush.msra.mxu0 %v351_v2  ;;  %v419_v17 = vld [vmem:[%s1158_s16 + $0x20] sm:$0xff]  ;;  %v422_v18 = vld [vmem:[%s1158_s16 + $0x38] sm:$0xff]  ;;  %v388_v19 = vld [vmem:[#allocation8 + $0x20] sm:$0xff] }
  0x4d   : > { %374 = vmatpush.msra.mxu1 %v350_v3  ;;  %739 = vmatpush.msra.mxu2 %v350_v3  ;;  %v387_v20 = vld [vmem:[#allocation8 + $0x18] sm:$0xff]  ;;  %v386_v21 = vld [vmem:[#allocation8 + $0x10] sm:$0xff]  ;;  %v385_v23 = vld [vmem:[#allocation8 + $0x8] sm:$0xff] }
  0x4e   : > { %740 = vmatpush.msra.mxu3 %v350_v3  ;;  %458 = vmatpush.msra.mxu0 %v350_v3  ;;  %v416_v22 = vld [vmem:[%s1158_s16 + $0x8] sm:$0xff]  ;;  %v384_v24 = vld [vmem:[#allocation8] sm:$0xff]  ;;  %v816_v25 = vld [vmem:[%s1230_s3] ss:$0 sm:$0xff] }
  0x4f   : > { %375 = vmatpush.msra.mxu1 %v349_v4  ;;  %741 = vmatpush.msra.mxu2 %v349_v4 }
  0x50   : > { %742 = vmatpush.msra.mxu3 %v349_v4  ;;  %459 = vmatpush.msra.mxu0 %v349_v4 }
  0x51   : > { %376 = vmatpush.msra.mxu1 %v348_v5  ;;  %743 = vmatpush.msra.mxu2 %v348_v5 }
  0x52   : > { %744 = vmatpush.msra.mxu3 %v348_v5  ;;  %460 = vmatpush.msra.mxu0 %v348_v5 }
  0x53   : > { %377 = vmatpush.msra.mxu1 %v347_v6  ;;  %745 = vmatpush.msra.mxu2 %v347_v6 }
  0x54   : > { %746 = vmatpush.msra.mxu3 %v347_v6  ;;  %461 = vmatpush.msra.mxu0 %v347_v6 }
  0x55   : > { %378 = vmatpush.msra.mxu1 %v346_v7  ;;  %747 = vmatpush.msra.mxu2 %v346_v7 }
  0x56   : > { %720 = vmatmul.msk.f32.vlgmr.msra.gmra.mxu1 %vm359_vm0, %v355_v8  ;;  %748 = vmatpush.msra.mxu3 %v346_v7 }
  0x57   : > { %724 = vmatmul.msk.f32.vlgmr.msra.gmra.mxu2 %vm359_vm0, %v417_v9  ;;  %727 = vmatmul.msk.f32.vlgmr.msra.gmra.mxu3 %vm359_vm0, %v420_v10 }
  0x58   : > { %403 = vmatpush.msrb.mxu1 %v391_v11  ;;  %462 = vmatpush.msra.mxu0 %v346_v7 }
  0x59   : > { %722 = vmatmul.msk.f32.vlgmr.msra.gmra.mxu0 %vm359_vm0, %v415_v12 }
  0x5a   : > { %404 = vmatpush.msrb.mxu1 %v390_v13 }
  0x5c   : > { %405 = vmatpush.msrb.mxu1 %v389_v14 }
  0x5e   : > { %406 = vmatpush.msrb.mxu1 %v388_v19 }
  0x5f   : > { %725 = vmatmul.msk.f32.gmra.mxu2 %vm359_vm0, %v418_v15  ;;  %728 = vmatmul.msk.f32.gmra.mxu3 %vm359_vm0, %v421_v16 }
  0x60   : > { %407 = vmatpush.msrb.mxu1 %v387_v20 }
  0x61   : > { %723 = vmatmul.msk.f32.gmra.mxu0 %vm359_vm0, %v416_v22 }
  0x62   : > { %408 = vmatpush.msrb.mxu1 %v386_v21 }
  0x64   : > { %409 = vmatpush.msrb.mxu1 %v385_v23 }
  0x66   : > { %410 = vmatpush.msrb.mxu1 %v384_v24  ;;  %v570_v24 = vlaneseq }
  0x67   : > { %726 = vmatmul.msk.f32.gmra.mxu2 %vm359_vm0, %v419_v17  ;;  %729 = vmatmul.msk.f32.gmra.mxu3 %vm359_vm0, %v422_v18 }
  0xd3   : > { %v380_v26 = vpop.f32.mrf.mxu1 }
  0xd4   : > { %v381_v27 = vadd.f32 %v816_v25, %v380_v26  ;;  %v571_v26 = vand.u32 127, %v570_v24 }
  0xd6   : > { %817 = vtanh.f32 %v381_v27  ;;  %v464_v32 = vpop.f32.mrf.mxu0 }
  0xd7   : > { %v465_v34 = vadd.f32 %v816_v25, %v464_v32 }
  0xd9   : > { %819 = vtanh.f32 %v465_v34 }
  0xda   : > { %v470_v29 = vpop.f32.mrf.mxu2  ;;  %v479_v31 = vpop.f32.mrf.mxu3 }
  0xdb   : > { %v471_v38 = vadd.f32 %v816_v25, %v470_v29  ;;  %v480_v40 = vadd.f32 %v816_v25, %v479_v31 }
  0xdc   : > { %v818_v28 = vpop.eup %817 }
  0xdd   : > { %721 = vmatmul.msk.f32.vlgmr.msrb.gmra.mxu1 %vm359_vm0, %v818_v28 }
  0xde   : > { %v467_v37 = vpop.f32.mrf.mxu0 }
  0xdf   : > { %v468_v39 = vadd.f32 %v816_v25, %v467_v37  ;;  %v820_v41 = vpop.eup %819 }
  0xe2   : > { %v473_v30 = vpop.f32.mrf.mxu2  ;;  %v482_v36 = vpop.f32.mrf.mxu3 }
  0xe3   : > { %v474_v42 = vadd.f32 %v816_v25, %v473_v30  ;;  %v483_v56 = vadd.f32 %v816_v25, %v482_v36 }
  0xea   : > { %v476_v33 = vpop.f32.mrf.mxu2  ;;  %v485_v50 = vpop.f32.mrf.mxu3 }
  0xeb   : > { %v477_v35 = vadd.f32 %v816_v25, %v476_v33  ;;  %v486_v62 = vadd.f32 %v816_v25, %v485_v50  ;;  %v553_v25 = vstv %s552_s23 }
  0xed   : > { %821 = vtanh.f32 %v477_v35 }
  0xee   : > { %823 = vtanh.f32 %v471_v38 }
  0xef   : > { %825 = vtanh.f32 %v468_v39 }
  0xf0   : > { %827 = vtanh.f32 %v480_v40 }
  0xf1   : > { %829 = vtanh.f32 %v474_v42 }
  0xf2   : > { %831 = vtanh.f32 %v483_v56 }
  0xf3   : > { %v822_v48 = vpop.eup %821  ;;  %833 = vtanh.f32 %v486_v62 }
  0xf4   : > { %v824_v55 = vpop.eup %823 }
  0xf5   : > { %v826_v61 = vpop.eup %825 }
  0xf6   : > { %v828_v3 = vpop.eup %827 }
  0xf7   : > { %v830_v6 = vpop.eup %829 }
  0xf8   : > { %v832_v12 = vpop.eup %831 }
  0xf9   : > { %v834_v16 = vpop.eup %833 }
 0x15a   : > { %v412_v43 = vpop.f32.mrf.mxu1 }
 0x15b   : > { %v504_v44 = vperm.slane %v412_v43, 0  ;;  %v500_v45 = vrot.slane %v412_v43, 4  ;;  %v498_v46 = vrot.slane %v412_v43, 2  ;;  %v497_v47 = vrot.slane %v412_v43, 1 }
 0x15c   : > { %v501_v49 = vrot.slane %v412_v43, 5  ;;  %v499_v54 = vrot.slane %v412_v43, 3  ;;  %v502_v5 = vrot.slane %v412_v43, 6  ;;  %v503_v9 = vrot.slane %v412_v43, 7 }
 0x15d   : > { %v520_v51 = vmul.f32 %v820_v41, %v504_v44  ;;  %v508_v52 = vperm.slane %v500_v45, 0  ;;  %v506_v53 = vperm.slane %v498_v46, 0  ;;  %v505_v60 = vperm.slane %v497_v47, 0 }
 0x15e   : > { %v509_v1 = vperm.slane %v501_v49, 0  ;;  %v507_v2 = vperm.slane %v499_v54, 0  ;;  %v510_v11 = vperm.slane %v502_v5, 0  ;;  %v511_v15 = vperm.slane %v503_v9, 0 }
 0x15f   : > { %v528_v57 = vsel %vm359_vm0, %v520_v51, 0.0  ;;  %v524_v58 = vmul.f32 %v822_v48, %v508_v52  ;;  %v522_v59 = vmul.f32 %v824_v55, %v506_v53  ;;  %v521_v4 = vmul.f32 %v826_v61, %v505_v60 }
 0x160   : > { %529 = vadd.xlane.f32.xlu0 %v528_v57  ;;  %v525_v7 = vmul.f32 %v828_v3, %v509_v1  ;;  %v523_v8 = vmul.f32 %v830_v6, %v507_v2  ;;  %v526_v17 = vmul.f32 %v832_v12, %v510_v11  ;;  %v527_v18 = vmul.f32 %v834_v16, %v511_v15 }
 0x161   : > { %v540_v63 = vsel %vm359_vm0, %v524_v58, 0.0  ;;  %v534_v0 = vsel %vm359_vm0, %v522_v59, 0.0  ;;  %v531_v10 = vsel %vm359_vm0, %v521_v4, 0.0 }
 0x162   : > { %541 = vadd.xlane.f32.xlu2 %v540_v63  ;;  %535 = vadd.xlane.f32.xlu1 %v534_v0  ;;  %v543_v13 = vsel %vm359_vm0, %v525_v7, 0.0  ;;  %v537_v14 = vsel %vm359_vm0, %v523_v8, 0.0  ;;  %v546_v19 = vsel %vm359_vm0, %v526_v17, 0.0  ;;  %v549_v20 = vsel %vm359_vm0, %v527_v18, 0.0 }
 0x168   : > { %532 = vadd.xlane.f32.xlu0 %v531_v10 }
 0x16a   : > { %544 = vadd.xlane.f32.xlu2 %v543_v13  ;;  %538 = vadd.xlane.f32.xlu1 %v537_v14 }
 0x170   : > { %547 = vadd.xlane.f32.xlu0 %v546_v19 }
 0x172   : > { %550 = vadd.xlane.f32.xlu1 %v549_v20 }
 0x1d3   : > { %v530_v21 = vpop.xlane.xlu0 %529 }
 0x1d4   : > { %v554_v27 = vadd.f32 %v553_v25, %v530_v21 }
 0x1d5   : > { %v542_v22 = vpop.xlane.xlu2 %541  ;;  %v536_v23 = vpop.xlane.xlu1 %535 }
 0x1d6   : > { %v556_v28 = vadd.f32 %v553_v25, %v536_v23  ;;  %v572_v32 = vperm.slane %v554_v27, %v571_v26  ;;  %v558_v33 = vadd.f32 %v553_v25, %v542_v22 }
 0x1d8   : > { %v574_v37 = vperm.slane %v556_v28, %v571_v26  ;;  %v576_v42 = vperm.slane %v558_v33, %v571_v26 }
 0x1db   : > { %v533_v29 = vpop.xlane.xlu0 %532 }
 0x1dc   : > { %v555_v30 = vadd.f32 %v553_v25, %v533_v29 }
 0x1dd   : > { %v539_v31 = vpop.xlane.xlu1 %538  ;;  %v545_v35 = vpop.xlane.xlu2 %544 }
 0x1de   : > { %v573_v34 = vperm.slane %v555_v30, %v571_v26  ;;  %v557_v36 = vadd.f32 %v553_v25, %v539_v31  ;;  %v559_v40 = vadd.f32 %v553_v25, %v545_v35 }
 0x1e0   : > { %v581_v38 = vsel %vm580_vm1, %v573_v34, %v572_v32  ;;  %v575_v39 = vperm.slane %v557_v36, %v571_v26  ;;  %v577_v47 = vperm.slane %v559_v40, %v571_v26 }
 0x1e1   : > { %v583_v41 = vsel %vm582_vm2, %v574_v37, %v581_v38 }
 0x1e2   : > { %v585_v43 = vsel %vm584_vm3, %v575_v39, %v583_v41 }
 0x1e3   : > { %v548_v44 = vpop.xlane.xlu0 %547  ;;  %v587_v45 = vsel %vm586_vm4, %v576_v42, %v585_v43 }
 0x1e4   : > { %v560_v46 = vadd.f32 %v553_v25, %v548_v44  ;;  %v589_v51 = vsel %vm588_vm5, %v577_v47, %v587_v45 }
 0x1e5   : > { %v551_v48 = vpop.xlane.xlu1 %550 }
 0x1e6   : > { %v578_v49 = vperm.slane %v560_v46, %v571_v26  ;;  %v561_v50 = vadd.f32 %v553_v25, %v551_v48 }
 0x1e8   : > { %v591_v52 = vsel %vm590_vm6, %v578_v49, %v589_v51  ;;  %v579_v53 = vperm.slane %v561_v50, %v571_v26 }
 0x1ea   : > { %v593_v54 = vsel %vm592_vm7, %v579_v53, %v591_v52 }
 0x1eb   : > { %596 = vst.msk [vmem:[%s345_s28] sm:$0xff] %vm595_vm8, %v593_v54 }
 0x1ec PF: > { %p21_p4 = scmp.ge.s32.totalorder %s1097_s17, 4   ;;  %s1239_s23 = smov %s993_s24 }
 0x1ed   : > { %s1240_s24 = smov %s997_s25  ;;  %s1241_s25 = smov %s1110_s21 }
 0x1ee   : > { %s1242_s26 = smov %s1097_s17  ;;  %23 = sbr.rel (!%p21_p4) target bundleno = 9 (0x9), region = 105 }
 0x1f3   :  { %616 = vsyncpa [#allocation4], 1 }
 0x1f4   :  { %618 = vsyncpa [#allocation4 + $0x1], 1 }
 0x1f5   :  { %619 = vsyncpa [#allocation6], 1 }
 0x1f6   :  { %621 = vsyncpa [#allocation6 + $0x1], 1 }
 0x1f7   :  { %622 = vsyncpa [#allocation9], 1 }

// kernel: tpu_custom_call.1
= control target key start
LH: loop header
LB: loop body
LE: loop exit
PB: predicated region body
PF: predicated region fallthrough
CT: control target
= control target key end

     0   :  { %s1227_s0 = inlined_call_operand.hbm [shape: f32[16,8,64], index: 0, kind: input, shape index: {}]   ;;  %s1228_s1 = inlined_call_operand.hbm [shape: f32[16,64], index: 1, kind: input, shape index: {}]   ;;  %s1229_s2 = inlined_call_operand.hbm [shape: f32[64,64], index: 2, kind: input, shape index: {}]   ;;  %s1230_s3 = inlined_call_operand.vmem [shape: f32[1,64], index: 3, kind: input, shape index: {}]   ;;  %s1231_s4 = inlined_call_operand.hbm [shape: f32[64,64], index: 4, kind: input, shape index: {}]   ;;  %s1232_s5 = inlined_call_operand.<no memory space> [shape: f32[1,1], index: 5, kind: input, shape index: {}]   ;;  %s1233_s6 = inlined_call_operand.vmem [shape: f32[16,8], index: 6, kind: output, shape index: {}]  }
   0x1   :  { %1234 = sst [smem:[#allocation14_spill]] %s1229_s2 }
   0x2   :  { %11 = sst [smem:[#allocation2]] %s1232_s5 }
   0x3   :  { %12 = vsyncpa [#allocation4], 0 }
   0x4   :  { %14 = vsyncpa [#allocation4 + $0x1], 0 }
   0x5   :  { %15 = vsyncpa [#allocation6], 0 }
   0x6   :  { %17 = vsyncpa [#allocation6 + $0x1], 0 }
   0x7   :  { %18 = vsyncpa [#allocation9], 0  ;;  %s1045_s23 = smov 0   ;;  %s1047_s24 = smov 0  }
   0x8   :  { %s1049_s25 = smov 0   ;;  %s1051_s26 = smov 0  }
   0x9 LB: > { %s1064_s5 = sadd.s32 4294967295, %s1001_s26   ;;  %p44_p0 = scmp.ne.s32.totalorder %s993_s24, %s989_s23  ;;  %s1001_s26 = sphi %s1051_s26, %s1242_s26   ;;  %s997_s25 = sphi %s1049_s25, %s1241_s25   ;;  %s993_s24 = sphi %s1047_s24, %s1240_s24   ;;  %s989_s23 = sphi %s1045_s23, %s1239_s23  }
   0xa   : > { %p45_p1 = scmp.eq.s32.totalorder %s1064_s5, 0  ;;  %p705_p2 = scmp.ge.s32.totalorder %s1001_s26, 1 }
   0xb   : > { %p191_p3 = scmp.lt.s32.totalorder %s1001_s26, 3  ;;  %s1236_s2 = sld [smem:[#allocation14_spill]] }
   0xc   : > { %p1072_p4 = por %p45_p1, %p44_p0  ;;  %s1003_s8 = smov [#allocation7]  }
   0xd   : > { %p1079_p5 = pnand %p705_p2, %p191_p3  ;;  %s204_s9 = sshll.u32 %s1003_s8, 4  ;;  %s205_s9 = int_to_ptr.vmem [resolvable:$true] %s204_s9 }
   0xe   : > { %s219_s12 = sshll.u32 %s1231_s4, 4  ;;  %s1004_s13 = smov 128   ;;  %s220_s12 = int_to_ptr.hbm [resolvable:$true] %s219_s12 }
   0xf   : > { %p761_p6 = pneg %p1079_p5  ;;  %s1005_s14 = smov 8  }
  0x10   : > { %s1006_s15 = smov [#allocation8]   ;;  %s1097_s17 = sadd.s32 1, %s1001_s26  }
  0x11   : > { %s202_s30 = sshll.u32 %s1236_s2, 4  ;;  %p762_p7 = pnand %p761_p6, %p45_p1  ;;  %s203_s30 = int_to_ptr.hbm [resolvable:$true] %s202_s30 }
  0x12   : > { %s221_s16 = sshll.u32 %s1006_s15, 4  ;;  %s31_s18 = sadd.s32 1, %s997_s25  ;;  %s222_s16 = int_to_ptr.vmem [resolvable:$true] %s221_s16 }
  0x13   : > { %764 = dma.hbm_to_vmem [thread:$0]  (!%p762_p7), %s203_s30, 1024, %s205_s9, [#allocation6], %s1004_s13, %s1004_s13, %s1005_s14  }
  0x14   : > { %767 = dma.hbm_to_vmem [thread:$0]  (!%p762_p7), %s220_s12, 1024, %s222_s16, [#allocation9], %s1004_s13, %s1004_s13, %s1005_s14  }
  0x15   : > { %s28_s19 = ssub.s32 %s1001_s26, %s1097_s17  ;;  %p38_p8 = scmp.ne.s32.totalorder %s997_s25, %s993_s24 }
  0x16   : > { %p29_p9 = scmp.eq.s32.totalorder %s28_s19, 0  ;;  %p39_p10 = scmp.eq.s32.totalorder %s1001_s26, 0 }
  0x17   : > { %p777_p11 = scmp.lt.s32.totalorder %s1001_s26, 2  ;;  %s1107_s20 = sand.u32 1, %s997_s25  }
  0x18   : > { %s1110_s21 = scalar_select %p29_p9, %s997_s25, %s31_s18  }
  0x19   : > { %p40_p12 = por %p39_p10, %p38_p8  ;;  %s709_s22 = sshll.u32 %s1107_s20, 6 }
  0x1a   : > { %s732_s23 = sshll.u32 %s1001_s26, 6  ;;  %s242_s9 = scalar_lea.vmem [#allocation3], %s709_s22 }
  0x1b   : > { %s247_s30 = scalar_lea.hbm %s1227_s0, %s732_s23  ;;  %s250_s10 = sshll.u32 %s242_s9, 4  ;;  %s251_s10 = int_to_ptr.vmem [resolvable:$true] %s250_s10 }
  0x1c   : > { %s248_s8 = sshll.u32 %s247_s30, 4  ;;  %p1117_p13 = pnand %p777_p11, %p40_p12  ;;  %s249_s8 = int_to_ptr.hbm [resolvable:$true] %s248_s8 }
  0x1d   : > { %s260_s12 = sand.u32 1, %s1001_s26   ;;  %s712_s15 = sshll.u32 %s1107_s20, 3 }
  0x1e   : > { %s239_s16 = scalar_lea.sflag [#allocation4], %s1107_s20  ;;  %s895_s18 = sshra.s32 %s249_s8, 4  ;;  %s896_s18 = int_to_ptr.hbm [resolvable:$true] %s895_s18 }
  0x1f   : > { %s897_s19 = scalar_lea.hbm %s896_s18, 64  ;;  %p899_p2 = pneg %p1117_p13 }
  0x20   : > { %p898_p0 = scmp.ne.s32.totalorder %s896_s18, %s897_s19  ;;  %s902_s28 = scalar_lea.hbm %s1227_s0, 128 }
  0x21   : > { %p903_p7 = scmp.lt.s32.totalorder %s896_s18, %s1227_s0  ;;  %p904_p8 = scmp.lt.s32.totalorder %s902_s28, %s897_s19 }
  0x22   : > { %p900_p3 = pnand %p899_p2, %p898_p0 }
  0x23   : > { %p905_p9 = por %p904_p8, %p903_p7 }
  0x24   : > { %p901_p6 = pneg %p900_p3 }
  0x26   : > { %p906_p10 = pnand %p905_p9, %p901_p6 }
  0x28   : > { %909 = shalt.err (!%p906_p10)
}
  0x29   : > { %771 = dma.hbm_to_vmem [thread:$0]  (!%p1117_p13), %s249_s8, 1024, %s251_s10, %s239_s16, %s1004_s13, %s1004_s13, %s1005_s14  }
  0x2a   : > { %s713_s20 = sshll.u32 %s1001_s26, 3  ;;  %s264_s9 = scalar_lea.vmem [#allocation5], %s712_s15 }
  0x2b   : > { %s272_s22 = sshll.u32 %s264_s9, 4  ;;  %s268_s29 = scalar_lea.hbm %s1228_s1, %s713_s20  ;;  %s273_s22 = int_to_ptr.vmem [resolvable:$true] %s272_s22 }
  0x2c   : > { %s270_s18 = sshll.u32 %s268_s29, 4  ;;  %s261_s19 = scalar_lea.sflag [#allocation6], %s260_s12  ;;  %s271_s18 = int_to_ptr.hbm [resolvable:$true] %s270_s18 }
  0x2d   : > { %s925_s28 = sshra.s32 %s271_s18, 4  ;;  %s932_s14 = scalar_lea.hbm %s1228_s1, 16  ;;  %s926_s28 = int_to_ptr.hbm [resolvable:$true] %s925_s28 }
  0x2e   : > { %s927_s30 = scalar_lea.hbm %s926_s28, 8  ;;  %p933_p3 = scmp.lt.s32.totalorder %s926_s28, %s1228_s1 }
  0x2f   : > { %p928_p11 = scmp.ne.s32.totalorder %s926_s28, %s927_s30  ;;  %p934_p6 = scmp.lt.s32.totalorder %s932_s14, %s927_s30 }
  0x31   : > { %p930_p12 = pnand %p928_p11, %p899_p2  ;;  %p935_p7 = por %p934_p6, %p933_p3 }
  0x33   : > { %p931_p0 = pneg %p930_p12 }
  0x35   : > { %p936_p8 = pnand %p935_p7, %p931_p0 }
  0x37   : > { %939 = shalt.err (!%p936_p8)
}
  0x38   : > { %774 = dma.hbm_to_vmem [thread:$0]  (!%p1117_p13), %s271_s18, 128, %s273_s22, %s261_s19  }
  0x39   : > { %281 = sbr.rel (%p1079_p5) target bundleno = 492 (0x1ec), region = 44  ;;  %s283_s2 = sand.u32 (!%p1079_p5), 1, %s993_s24  }
  0x3a   : > { %s715_s12 = sshll.u32 (!%p1079_p5), %s283_s2, 6  ;;  %s284_s15 = scalar_lea.sflag (!%p1079_p5), [#allocation4], %s283_s2 }
  0x3b   : > { %s1158_s16 = scalar_lea.vmem (!%p1079_p5), [#allocation3], %s715_s12 }
  0x3e   : > { %972 = dma.done.wait (%p1072_p4), %s284_s15, 1024  }
  0x3f   : > { %974 = vsyncadd (%p1072_p4), %s284_s15, 4294966272  ;;  %s293_s20 = sand.u32 1, %s1064_s5   ;;  %s716_s11 = sshll.u32 %s283_s2, 3 }
  0x40   : > { %s294_s9 = scalar_lea.sflag [#allocation6], %s293_s20  ;;  %s1165_s22 = scalar_lea.vmem [#allocation5], %s716_s11 }
  0x41   : > { %976 = dma.done.wait (%p1072_p4), %s294_s9, 128  }
  0x42   : > { %978 = vsyncadd (%p1072_p4), %s294_s9, 4294967168 }
  0x43   : > { %980 = dma.done.wait (%p45_p1), [#allocation6], 1024  }
  0x44   : > { %982 = vsyncadd (%p45_p1), [#allocation6], 4294966272 }
  0x45   : > { %984 = dma.done.wait (%p45_p1), [#allocation9], 1024  }
  0x46   : > { %986 = vsyncadd (%p45_p1), [#allocation9], 4294966272  ;;  %v353_v0 = vld [vmem:[#allocation7 + $0x38] sm:$0xff]  ;;  %v352_v1 = vld [vmem:[#allocation7 + $0x30] sm:$0xff]  ;;  %vm359_vm0 = vcmask 523264   ;;  %s552_s23 = sld [smem:[#allocation2]] }
  0x47   : > { %371 = vmatpush.msra.mxu1 %v353_v0  ;;  %733 = vmatpush.msra.mxu2 %v353_v0  ;;  %v351_v2 = vld [vmem:[#allocation7 + $0x28] sm:$0xff]  ;;  %v350_v3 = vld [vmem:[#allocation7 + $0x20] sm:$0xff]  ;;  %v349_v4 = vld [vmem:[#allocation7 + $0x18] sm:$0xff]  ;;  %vm580_vm1 = vcmask 1041409   ;;  %vm582_vm2 = vcmask 1042434   ;;  %p342_p1 = scmp.lt.s32.totalorder %s1064_s5, 1 }
  0x48   : > { %734 = vmatpush.msra.mxu3 %v353_v0  ;;  %455 = vmatpush.msra.mxu0 %v353_v0  ;;  %v348_v5 = vld [vmem:[#allocation7 + $0x10] sm:$0xff]  ;;  %v347_v6 = vld [vmem:[#allocation7 + $0x8] sm:$0xff]  ;;  %v346_v7 = vld [vmem:[#allocation7] sm:$0xff]  ;;  %vm584_vm3 = vcmask 1043459   ;;  %vm586_vm4 = vcmask 1044484   ;;  %vm588_vm5 = vcmask 1045509  }
  0x49   : > { %372 = vmatpush.msra.mxu1 %v352_v1  ;;  %735 = vmatpush.msra.mxu2 %v352_v1  ;;  %v355_v8 = vld [vmem:[%s1165_s22] sm:$0xff]  ;;  %v417_v9 = vld [vmem:[%s1158_s16 + $0x10] sm:$0xff]  ;;  %v389_v14 = vld [vmem:[#allocation8 + $0x28] sm:$0xff]  ;;  %s1244_s5 = smov (!%p342_p1, %s1064_s5), 1  ;;  %vm590_vm6 = vcmask 1046534   ;;  %vm592_vm7 = vcmask 1047559  }
  0x4a   : > { %736 = vmatpush.msra.mxu3 %v352_v1  ;;  %456 = vmatpush.msra.mxu0 %v352_v1  ;;  %v420_v10 = vld [vmem:[%s1158_s16 + $0x28] sm:$0xff]  ;;  %v415_v12 = vld [vmem:[%s1158_s16] sm:$0xff]  ;;  %v418_v15 = vld [vmem:[%s1158_s16 + $0x18] sm:$0xff]  ;;  %s719_s29 = sshll.u32 %s1244_s5, 3  ;;  %vm595_vm8 = vcmask 64512  }
  0x4b   : > { %373 = vmatpush.msra.mxu1 %v351_v2  ;;  %737 = vmatpush.msra.mxu2 %v351_v2  ;;  %v391_v11 = vld [vmem:[#allocation8 + $0x38] sm:$0xff]  ;;  %v390_v13 = vld [vmem:[#allocation8 + $0x30] sm:$0xff]  ;;  %v421_v16 = vld [vmem:[%s1158_s16 + $0x30] sm:$0xff]  ;;  %s345_s28 = scalar_lea.vmem %s1233_s6, %s719_s29 }
  0x4c   : > { %738 = vmatpush.msra.mxu3 %v351_v2  ;;  %457 = vmatpush.msra.mxu0 %v351_v2  ;;  %v419_v17 = vld [vmem:[%s1158_s16 + $0x20] sm:$0xff]  ;;  %v422_v18 = vld [vmem:[%s1158_s16 + $0x38] sm:$0xff]  ;;  %v388_v19 = vld [vmem:[#allocation8 + $0x20] sm:$0xff] }
  0x4d   : > { %374 = vmatpush.msra.mxu1 %v350_v3  ;;  %739 = vmatpush.msra.mxu2 %v350_v3  ;;  %v387_v20 = vld [vmem:[#allocation8 + $0x18] sm:$0xff]  ;;  %v386_v21 = vld [vmem:[#allocation8 + $0x10] sm:$0xff]  ;;  %v385_v23 = vld [vmem:[#allocation8 + $0x8] sm:$0xff] }
  0x4e   : > { %740 = vmatpush.msra.mxu3 %v350_v3  ;;  %458 = vmatpush.msra.mxu0 %v350_v3  ;;  %v416_v22 = vld [vmem:[%s1158_s16 + $0x8] sm:$0xff]  ;;  %v384_v24 = vld [vmem:[#allocation8] sm:$0xff]  ;;  %v816_v25 = vld [vmem:[%s1230_s3] ss:$0 sm:$0xff] }
  0x4f   : > { %375 = vmatpush.msra.mxu1 %v349_v4  ;;  %741 = vmatpush.msra.mxu2 %v349_v4 }
  0x50   : > { %742 = vmatpush.msra.mxu3 %v349_v4  ;;  %459 = vmatpush.msra.mxu0 %v349_v4 }
  0x51   : > { %376 = vmatpush.msra.mxu1 %v348_v5  ;;  %743 = vmatpush.msra.mxu2 %v348_v5 }
  0x52   : > { %744 = vmatpush.msra.mxu3 %v348_v5  ;;  %460 = vmatpush.msra.mxu0 %v348_v5 }
  0x53   : > { %377 = vmatpush.msra.mxu1 %v347_v6  ;;  %745 = vmatpush.msra.mxu2 %v347_v6 }
  0x54   : > { %746 = vmatpush.msra.mxu3 %v347_v6  ;;  %461 = vmatpush.msra.mxu0 %v347_v6 }
  0x55   : > { %378 = vmatpush.msra.mxu1 %v346_v7  ;;  %747 = vmatpush.msra.mxu2 %v346_v7 }
  0x56   : > { %720 = vmatmul.msk.f32.vlgmr.msra.gmra.mxu1 %vm359_vm0, %v355_v8  ;;  %748 = vmatpush.msra.mxu3 %v346_v7 }
  0x57   : > { %724 = vmatmul.msk.f32.vlgmr.msra.gmra.mxu2 %vm359_vm0, %v417_v9  ;;  %727 = vmatmul.msk.f32.vlgmr.msra.gmra.mxu3 %vm359_vm0, %v420_v10 }
  0x58   : > { %403 = vmatpush.msrb.mxu1 %v391_v11  ;;  %462 = vmatpush.msra.mxu0 %v346_v7 }
  0x59   : > { %722 = vmatmul.msk.f32.vlgmr.msra.gmra.mxu0 %vm359_vm0, %v415_v12 }
  0x5a   : > { %404 = vmatpush.msrb.mxu1 %v390_v13 }
  0x5c   : > { %405 = vmatpush.msrb.mxu1 %v389_v14 }
  0x5e   : > { %406 = vmatpush.msrb.mxu1 %v388_v19 }
  0x5f   : > { %725 = vmatmul.msk.f32.gmra.mxu2 %vm359_vm0, %v418_v15  ;;  %728 = vmatmul.msk.f32.gmra.mxu3 %vm359_vm0, %v421_v16 }
  0x60   : > { %407 = vmatpush.msrb.mxu1 %v387_v20 }
  0x61   : > { %723 = vmatmul.msk.f32.gmra.mxu0 %vm359_vm0, %v416_v22 }
  0x62   : > { %408 = vmatpush.msrb.mxu1 %v386_v21 }
  0x64   : > { %409 = vmatpush.msrb.mxu1 %v385_v23 }
  0x66   : > { %410 = vmatpush.msrb.mxu1 %v384_v24  ;;  %v570_v24 = vlaneseq }
  0x67   : > { %726 = vmatmul.msk.f32.gmra.mxu2 %vm359_vm0, %v419_v17  ;;  %729 = vmatmul.msk.f32.gmra.mxu3 %vm359_vm0, %v422_v18 }
  0xd3   : > { %v380_v26 = vpop.f32.mrf.mxu1 }
  0xd4   : > { %v381_v27 = vadd.f32 %v816_v25, %v380_v26  ;;  %v571_v26 = vand.u32 127, %v570_v24 }
  0xd6   : > { %817 = vtanh.f32 %v381_v27  ;;  %v464_v32 = vpop.f32.mrf.mxu0 }
  0xd7   : > { %v465_v34 = vadd.f32 %v816_v25, %v464_v32 }
  0xd9   : > { %819 = vtanh.f32 %v465_v34 }
  0xda   : > { %v470_v29 = vpop.f32.mrf.mxu2  ;;  %v479_v31 = vpop.f32.mrf.mxu3 }
  0xdb   : > { %v471_v38 = vadd.f32 %v816_v25, %v470_v29  ;;  %v480_v40 = vadd.f32 %v816_v25, %v479_v31 }
  0xdc   : > { %v818_v28 = vpop.eup %817 }
  0xdd   : > { %721 = vmatmul.msk.f32.vlgmr.msrb.gmra.mxu1 %vm359_vm0, %v818_v28 }
  0xde   : > { %v467_v37 = vpop.f32.mrf.mxu0 }
  0xdf   : > { %v468_v39 = vadd.f32 %v816_v25, %v467_v37  ;;  %v820_v41 = vpop.eup %819 }
  0xe2   : > { %v473_v30 = vpop.f32.mrf.mxu2  ;;  %v482_v36 = vpop.f32.mrf.mxu3 }
  0xe3   : > { %v474_v42 = vadd.f32 %v816_v25, %v473_v30  ;;  %v483_v56 = vadd.f32 %v816_v25, %v482_v36 }
  0xea   : > { %v476_v33 = vpop.f32.mrf.mxu2  ;;  %v485_v50 = vpop.f32.mrf.mxu3 }
  0xeb   : > { %v477_v35 = vadd.f32 %v816_v25, %v476_v33  ;;  %v486_v62 = vadd.f32 %v816_v25, %v485_v50  ;;  %v553_v25 = vstv %s552_s23 }
  0xed   : > { %821 = vtanh.f32 %v477_v35 }
  0xee   : > { %823 = vtanh.f32 %v471_v38 }
  0xef   : > { %825 = vtanh.f32 %v468_v39 }
  0xf0   : > { %827 = vtanh.f32 %v480_v40 }
  0xf1   : > { %829 = vtanh.f32 %v474_v42 }
  0xf2   : > { %831 = vtanh.f32 %v483_v56 }
  0xf3   : > { %v822_v48 = vpop.eup %821  ;;  %833 = vtanh.f32 %v486_v62 }
  0xf4   : > { %v824_v55 = vpop.eup %823 }
  0xf5   : > { %v826_v61 = vpop.eup %825 }
  0xf6   : > { %v828_v3 = vpop.eup %827 }
  0xf7   : > { %v830_v6 = vpop.eup %829 }
  0xf8   : > { %v832_v12 = vpop.eup %831 }
  0xf9   : > { %v834_v16 = vpop.eup %833 }
 0x15a   : > { %v412_v43 = vpop.f32.mrf.mxu1 }
 0x15b   : > { %v504_v44 = vperm.slane %v412_v43, 0  ;;  %v500_v45 = vrot.slane %v412_v43, 4  ;;  %v498_v46 = vrot.slane %v412_v43, 2  ;;  %v497_v47 = vrot.slane %v412_v43, 1 }
 0x15c   : > { %v501_v49 = vrot.slane %v412_v43, 5  ;;  %v499_v54 = vrot.slane %v412_v43, 3  ;;  %v502_v5 = vrot.slane %v412_v43, 6  ;;  %v503_v9 = vrot.slane %v412_v43, 7 }
 0x15d   : > { %v520_v51 = vmul.f32 %v820_v41, %v504_v44  ;;  %v508_v52 = vperm.slane %v500_v45, 0  ;;  %v506_v53 = vperm.slane %v498_v46, 0  ;;  %v505_v60 = vperm.slane %v497_v47, 0 }
 0x15e   : > { %v509_v1 = vperm.slane %v501_v49, 0  ;;  %v507_v2 = vperm.slane %v499_v54, 0  ;;  %v510_v11 = vperm.slane %v502_v5, 0  ;;  %v511_v15 = vperm.slane %v503_v9, 0 }
 0x15f   : > { %v528_v57 = vsel %vm359_vm0, %v520_v51, 0.0  ;;  %v524_v58 = vmul.f32 %v822_v48, %v508_v52  ;;  %v522_v59 = vmul.f32 %v824_v55, %v506_v53  ;;  %v521_v4 = vmul.f32 %v826_v61, %v505_v60 }
 0x160   : > { %529 = vadd.xlane.f32.xlu0 %v528_v57  ;;  %v525_v7 = vmul.f32 %v828_v3, %v509_v1  ;;  %v523_v8 = vmul.f32 %v830_v6, %v507_v2  ;;  %v526_v17 = vmul.f32 %v832_v12, %v510_v11  ;;  %v527_v18 = vmul.f32 %v834_v16, %v511_v15 }
 0x161   : > { %v540_v63 = vsel %vm359_vm0, %v524_v58, 0.0  ;;  %v534_v0 = vsel %vm359_vm0, %v522_v59, 0.0  ;;  %v531_v10 = vsel %vm359_vm0, %v521_v4, 0.0 }
 0x162   : > { %541 = vadd.xlane.f32.xlu2 %v540_v63  ;;  %535 = vadd.xlane.f32.xlu1 %v534_v0  ;;  %v543_v13 = vsel %vm359_vm0, %v525_v7, 0.0  ;;  %v537_v14 = vsel %vm359_vm0, %v523_v8, 0.0  ;;  %v546_v19 = vsel %vm359_vm0, %v526_v17, 0.0  ;;  %v549_v20 = vsel %vm359_vm0, %v527_v18, 0.0 }
 0x168   : > { %532 = vadd.xlane.f32.xlu0 %v531_v10 }
 0x16a   : > { %544 = vadd.xlane.f32.xlu2 %v543_v13  ;;  %538 = vadd.xlane.f32.xlu1 %v537_v14 }
 0x170   : > { %547 = vadd.xlane.f32.xlu0 %v546_v19 }
 0x172   : > { %550 = vadd.xlane.f32.xlu1 %v549_v20 }
 0x1d3   : > { %v530_v21 = vpop.xlane.xlu0 %529 }
 0x1d4   : > { %v554_v27 = vadd.f32 %v553_v25, %v530_v21 }
 0x1d5   : > { %v542_v22 = vpop.xlane.xlu2 %541  ;;  %v536_v23 = vpop.xlane.xlu1 %535 }
 0x1d6   : > { %v556_v28 = vadd.f32 %v553_v25, %v536_v23  ;;  %v572_v32 = vperm.slane %v554_v27, %v571_v26  ;;  %v558_v33 = vadd.f32 %v553_v25, %v542_v22 }
 0x1d8   : > { %v574_v37 = vperm.slane %v556_v28, %v571_v26  ;;  %v576_v42 = vperm.slane %v558_v33, %v571_v26 }
 0x1db   : > { %v533_v29 = vpop.xlane.xlu0 %532 }
 0x1dc   : > { %v555_v30 = vadd.f32 %v553_v25, %v533_v29 }
 0x1dd   : > { %v539_v31 = vpop.xlane.xlu1 %538  ;;  %v545_v35 = vpop.xlane.xlu2 %544 }
 0x1de   : > { %v573_v34 = vperm.slane %v555_v30, %v571_v26  ;;  %v557_v36 = vadd.f32 %v553_v25, %v539_v31  ;;  %v559_v40 = vadd.f32 %v553_v25, %v545_v35 }
 0x1e0   : > { %v581_v38 = vsel %vm580_vm1, %v573_v34, %v572_v32  ;;  %v575_v39 = vperm.slane %v557_v36, %v571_v26  ;;  %v577_v47 = vperm.slane %v559_v40, %v571_v26 }
 0x1e1   : > { %v583_v41 = vsel %vm582_vm2, %v574_v37, %v581_v38 }
 0x1e2   : > { %v585_v43 = vsel %vm584_vm3, %v575_v39, %v583_v41 }
 0x1e3   : > { %v548_v44 = vpop.xlane.xlu0 %547  ;;  %v587_v45 = vsel %vm586_vm4, %v576_v42, %v585_v43 }
 0x1e4   : > { %v560_v46 = vadd.f32 %v553_v25, %v548_v44  ;;  %v589_v51 = vsel %vm588_vm5, %v577_v47, %v587_v45 }
 0x1e5   : > { %v551_v48 = vpop.xlane.xlu1 %550 }
 0x1e6   : > { %v578_v49 = vperm.slane %v560_v46, %v571_v26  ;;  %v561_v50 = vadd.f32 %v553_v25, %v551_v48 }
 0x1e8   : > { %v591_v52 = vsel %vm590_vm6, %v578_v49, %v589_v51  ;;  %v579_v53 = vperm.slane %v561_v50, %v571_v26 }
 0x1ea   : > { %v593_v54 = vsel %vm592_vm7, %v579_v53, %v591_v52 }
 0x1eb   : > { %596 = vst.msk [vmem:[%s345_s28] sm:$0xff] %vm595_vm8, %v593_v54 }
 0x1ec PF: > { %p21_p4 = scmp.ge.s32.totalorder %s1097_s17, 4   ;;  %s1239_s23 = smov %s993_s24 }
 0x1ed   : > { %s1240_s24 = smov %s997_s25  ;;  %s1241_s25 = smov %s1110_s21 }
 0x1ee   : > { %s1242_s26 = smov %s1097_s17  ;;  %23 = sbr.rel (!%p21_p4) target bundleno = 9 (0x9), region = 105 }
 0x1f3   :  { %616 = vsyncpa [#allocation4], 1 }
 0x1f4   :  { %618 = vsyncpa [#allocation4 + $0x1], 1 }
 0x1f5   :  { %619 = vsyncpa [#allocation6], 1 }
 0x1f6   :  { %621 = vsyncpa [#allocation6 + $0x1], 1 }
 0x1f7   :  { %622 = vsyncpa [#allocation9], 1 }

</bundles_post_ra>
